<compile_context>
chip_gen: v6e
topology: v6e:2x2x1
jax: 0.10.0
libtpu: 0.0.40
codegen_flags: <defaults>
</compile_context>

<pallas_src>
import functools

import jax
import jax.numpy as jnp
from jax.experimental import pallas as pl
from jax.experimental.pallas import tpu as pltpu

IN_SIZE = 4                      # Config.in_size  (iris features)
OUT_SIZE = 3                     # Config.out_size (one-hot iris classes)
HIDDEN_LAYERS = 10               # Config.hidden_layers
NUM_HIDDEN = HIDDEN_LAYERS - 1   # number of Linear(1,1,bias=False)+ReLU modules
LANES = 128


def _cdiv(a, b):
    return -(-a // b)


def network_kernel(s_ref, x_ref, o_ref):
    # s_ref: SMEM (7,) f32 = [w_in[0..3] | d[0..2]]   (scalar prefetch)
    # x_ref: VMEM (IN_SIZE, TBs, 128)   batch packed on sublanes+lanes
    # o_ref: VMEM (OUT_SIZE, TBs, 128)

    # ---- in_layer: Linear(4,1,bias=False) + ReLU, fully unrolled on the VPU ----
    h = x_ref[0] * s_ref[0]
    h = h + x_ref[1] * s_ref[1]
    h = h + x_ref[2] * s_ref[2]
    h = h + x_ref[3] * s_ref[3]
    h = jnp.maximum(h, 0.0)                       # (TBs, 128), h >= 0

    # ---- hidden chain + out_layer + softmax max-shift folded into d_j <= 0 ----
    # logits_j - max_k(logits_k) == h * d_j  (exact because h >= 0, scale >= 0)
    e0 = jnp.exp(h * s_ref[4])
    e1 = jnp.exp(h * s_ref[5])
    e2 = jnp.exp(h * s_ref[6])
    inv = pl.reciprocal(e0 + e1 + e2, approx=False)   # exact: keeps 1e-5 tolerance
    o_ref[0] = e0 * inv                           # full-tile, unmasked stores
    o_ref[1] = e1 * inv
    o_ref[2] = e2 * inv


@functools.partial(jax.jit, static_argnames=("block_sublanes",))
def network_forward(x, w_in, w_hid, w_out, block_sublanes=1024):
    """x: (B, IN); w_in: (1, IN); w_hid: (NUM_HIDDEN,); w_out: (1, OUT) == W_out.T."""
    B = x.shape[0]
    x = x.astype(jnp.float32)

    # ---- collapse all 16 parameters into 7 scalars (wrapper-side, one-off) ----
    # relu(h*w) == h*relu(w) for h >= 0, so the 9-layer chain is one non-negative
    # scalar; the softmax max-subtraction then also becomes a scalar shift.
    scale = jnp.prod(jnp.maximum(w_hid.reshape(-1).astype(jnp.float32), 0.0))
    sw = scale * w_out.reshape(-1).astype(jnp.float32)       # (OUT,)
    d = sw - jnp.max(sw)                                     # <= 0 -> exp args <= 0
    packed = jnp.concatenate([w_in.reshape(-1).astype(jnp.float32), d])  # (7,)

    # ---- lane-dense, sublane-packed layout: (IN, S, 128), batch = S*128 ----
    s_needed = _cdiv(B, LANES)
    tbs = min(block_sublanes, s_needed)          # clamp tile to the actual batch
    grid = _cdiv(s_needed, tbs)
    S = grid * tbs
    Bp = S * LANES

    xt = x.T                                      # (IN, B)
    if Bp != B:
        xt = jnp.pad(xt, ((0, 0), (0, Bp - B)))   # pad cols -> uniform softmax, sliced off
    xt = xt.reshape(IN_SIZE, S, LANES)            # free, contiguous reshape

    out = pl.pallas_call(
        network_kernel,
        out_shape=jax.ShapeDtypeStruct((OUT_SIZE, S, LANES), jnp.float32),
        grid_spec=pltpu.PrefetchScalarGridSpec(
            num_scalar_prefetch=1,               # 7 packed scalars -> SMEM
            grid=(grid,),
            in_specs=[pl.BlockSpec((IN_SIZE, tbs, LANES), lambda i, s: (0, i, 0))],
            out_specs=pl.BlockSpec((OUT_SIZE, tbs, LANES), lambda i, s: (0, i, 0)),
        ),
        compiler_params=pltpu.CompilerParams(
            dimension_semantics=("parallel",),   # shard batch tiles across TCs
            vmem_limit_bytes=32 * 1024 * 1024,   # ~7 MiB double-buffered at TBs=1024
        ),
    )(packed, xt)

    return out.reshape(OUT_SIZE, Bp)[:, :B].T     # (B, OUT)


def reference_forward(x, w_in, w_hid, w_out):
    # Pure-JAX reference mirroring the PyTorch forward exactly (sequential ReLUs).
    h = jnp.maximum(x @ w_in.T, 0.0)              # (B, 1)
    for i in range(NUM_HIDDEN):
        h = jnp.maximum(h * w_hid[i], 0.0)
    logits = h @ w_out                            # (B, OUT)
    return jax.nn.softmax(logits, axis=1)


if __name__ == "__main__":
    key = jax.random.PRNGKey(0)
    k_x, k_in, k_hid_pos, k_hid_mix, k_out = jax.random.split(key, 5)

    # Parameters (mimic nn.Linear default U(-1/sqrt(fan_in), +1/sqrt(fan_in))).
    w_in = jax.random.uniform(k_in, (1, IN_SIZE), jnp.float32, -0.5, 0.5)     # fan_in=4
    w_out = jax.random.uniform(k_out, (1, OUT_SIZE), jnp.float32, -1.0, 1.0)  # fan_in=1

    # Two hidden-weight regimes: all-positive (non-trivial softmax) and
    # mixed-sign (exercises the ReLU gate that zeroes the chain).
    w_hid_pos = jax.random.uniform(k_hid_pos, (NUM_HIDDEN,), jnp.float32, 0.1, 1.0)
    w_hid_mix = jax.random.uniform(k_hid_mix, (NUM_HIDDEN,), jnp.float32, -1.0, 1.0)

    ok = True
    # (B=37, big tile)   -> single step, pad+slice path
    # (B=2000, tiny tile) -> grid of 2 steps, exercises the pipelined grid loop
    for B, tbs in ((37, 1024), (2000, 8)):
        xk = jax.random.fold_in(k_x, B)
        x = jax.random.normal(xk, (B, IN_SIZE), dtype=jnp.float32)
        for w_hid in (w_hid_pos, w_hid_mix):
            out = jax.block_until_ready(
                network_forward(x, w_in, w_hid, w_out, block_sublanes=tbs))
            ref = reference_forward(x, w_in, w_hid, w_out)
            assert out.shape == (B, OUT_SIZE)
            ok = ok and bool(jnp.allclose(out, ref, atol=1e-5, rtol=1e-5))

    assert ok, "mismatch vs JAX reference"
    print("KERNEL_OK")
</pallas_src>

<mosaic_0001>
module attributes {stable_mosaic.version = 11 : i64} {
  func.func @network_kernel(%arg0: i32, %arg1: memref<7xf32, #tpu.memory_space<smem>>, %arg2: memref<4x1x128xf32, #tpu.memory_space<vmem>>, %arg3: memref<3x1x128xf32, #tpu.memory_space<vmem>>) attributes {dimension_semantics = [#tpu.dimension_semantics<parallel>], iteration_bounds = array<i64: 1>, scalar_prefetch = 1 : i64, scratch_operands = 0 : i64, tpu.core_type = #tpu.core_type<tc>, window_params = [{transform_indices = @transform_0, window_bounds = array<i64: 4, 1, 128>}, {transform_indices = @transform_1, window_bounds = array<i64: 3, 1, 128>}]} {
    %c0 = arith.constant 0 : index
    %c0_0 = arith.constant 0 : index
    %c0_1 = arith.constant 0 : index
    %0 = vector.load %arg2[%c0, %c0_0, %c0_1] : memref<4x1x128xf32, #tpu.memory_space<vmem>>, vector<1x1x128xf32>
    %1 = vector.shape_cast %0 : vector<1x1x128xf32> to vector<1x128xf32>
    %c0_2 = arith.constant 0 : index
    %2 = memref.load %arg1[%c0_2] : memref<7xf32, #tpu.memory_space<smem>>
    %3 = vector.broadcast %2 : f32 to vector<1x128xf32>
    %4 = arith.mulf %1, %3 : vector<1x128xf32>
    %c1 = arith.constant 1 : index
    %c0_3 = arith.constant 0 : index
    %c0_4 = arith.constant 0 : index
    %5 = vector.load %arg2[%c1, %c0_3, %c0_4] : memref<4x1x128xf32, #tpu.memory_space<vmem>>, vector<1x1x128xf32>
    %6 = vector.shape_cast %5 : vector<1x1x128xf32> to vector<1x128xf32>
    %c1_5 = arith.constant 1 : index
    %7 = memref.load %arg1[%c1_5] : memref<7xf32, #tpu.memory_space<smem>>
    %8 = vector.broadcast %7 : f32 to vector<1x128xf32>
    %9 = arith.mulf %6, %8 : vector<1x128xf32>
    %10 = arith.addf %4, %9 : vector<1x128xf32>
    %c2 = arith.constant 2 : index
    %c0_6 = arith.constant 0 : index
    %c0_7 = arith.constant 0 : index
    %11 = vector.load %arg2[%c2, %c0_6, %c0_7] : memref<4x1x128xf32, #tpu.memory_space<vmem>>, vector<1x1x128xf32>
    %12 = vector.shape_cast %11 : vector<1x1x128xf32> to vector<1x128xf32>
    %c2_8 = arith.constant 2 : index
    %13 = memref.load %arg1[%c2_8] : memref<7xf32, #tpu.memory_space<smem>>
    %14 = vector.broadcast %13 : f32 to vector<1x128xf32>
    %15 = arith.mulf %12, %14 : vector<1x128xf32>
    %16 = arith.addf %10, %15 : vector<1x128xf32>
    %c3 = arith.constant 3 : index
    %c0_9 = arith.constant 0 : index
    %c0_10 = arith.constant 0 : index
    %17 = vector.load %arg2[%c3, %c0_9, %c0_10] : memref<4x1x128xf32, #tpu.memory_space<vmem>>, vector<1x1x128xf32>
    %18 = vector.shape_cast %17 : vector<1x1x128xf32> to vector<1x128xf32>
    %c3_11 = arith.constant 3 : index
    %19 = memref.load %arg1[%c3_11] : memref<7xf32, #tpu.memory_space<smem>>
    %20 = vector.broadcast %19 : f32 to vector<1x128xf32>
    %21 = arith.mulf %18, %20 : vector<1x128xf32>
    %22 = arith.addf %16, %21 : vector<1x128xf32>
    %cst = arith.constant 0.000000e+00 : f32
    %23 = vector.broadcast %cst : f32 to vector<1x128xf32>
    %24 = arith.maximumf %22, %23 : vector<1x128xf32>
    %c4 = arith.constant 4 : index
    %25 = memref.load %arg1[%c4] : memref<7xf32, #tpu.memory_space<smem>>
    %26 = vector.broadcast %25 : f32 to vector<1x128xf32>
    %27 = arith.mulf %24, %26 : vector<1x128xf32>
    %28 = math.exp %27 : vector<1x128xf32>
    %c5 = arith.constant 5 : index
    %29 = memref.load %arg1[%c5] : memref<7xf32, #tpu.memory_space<smem>>
    %30 = vector.broadcast %29 : f32 to vector<1x128xf32>
    %31 = arith.mulf %24, %30 : vector<1x128xf32>
    %32 = math.exp %31 : vector<1x128xf32>
    %c6 = arith.constant 6 : index
    %33 = memref.load %arg1[%c6] : memref<7xf32, #tpu.memory_space<smem>>
    %34 = vector.broadcast %33 : f32 to vector<1x128xf32>
    %35 = arith.mulf %24, %34 : vector<1x128xf32>
    %36 = math.exp %35 : vector<1x128xf32>
    %37 = arith.addf %28, %32 : vector<1x128xf32>
    %38 = arith.addf %37, %36 : vector<1x128xf32>
    %39 = tpu.reciprocal %38 : vector<1x128xf32> -> vector<1x128xf32>
    %40 = arith.mulf %28, %39 : vector<1x128xf32>
    %c0_12 = arith.constant 0 : index
    %c0_13 = arith.constant 0 : index
    %c0_14 = arith.constant 0 : index
    %41 = vector.load %arg3[%c0_12, %c0_13, %c0_14] : memref<3x1x128xf32, #tpu.memory_space<vmem>>, vector<1x1x128xf32>
    %42 = vector.shape_cast %41 : vector<1x1x128xf32> to vector<1x128xf32>
    %43 = vector.shape_cast %40 : vector<1x128xf32> to vector<1x1x128xf32>
    tpu.vector_store %arg3[%c0_12, %c0_13, %c0_14], %43 {strides = array<i32>} : memref<3x1x128xf32, #tpu.memory_space<vmem>>, vector<1x1x128xf32>,
    %44 = arith.mulf %32, %39 : vector<1x128xf32>
    %c1_15 = arith.constant 1 : index
    %c0_16 = arith.constant 0 : index
    %c0_17 = arith.constant 0 : index
    %45 = vector.load %arg3[%c1_15, %c0_16, %c0_17] : memref<3x1x128xf32, #tpu.memory_space<vmem>>, vector<1x1x128xf32>
    %46 = vector.shape_cast %45 : vector<1x1x128xf32> to vector<1x128xf32>
    %47 = vector.shape_cast %44 : vector<1x128xf32> to vector<1x1x128xf32>
    tpu.vector_store %arg3[%c1_15, %c0_16, %c0_17], %47 {strides = array<i32>} : memref<3x1x128xf32, #tpu.memory_space<vmem>>, vector<1x1x128xf32>,
    %48 = arith.mulf %36, %39 : vector<1x128xf32>
    %c2_18 = arith.constant 2 : index
    %c0_19 = arith.constant 0 : index
    %c0_20 = arith.constant 0 : index
    %49 = vector.load %arg3[%c2_18, %c0_19, %c0_20] : memref<3x1x128xf32, #tpu.memory_space<vmem>>, vector<1x1x128xf32>
    %50 = vector.shape_cast %49 : vector<1x1x128xf32> to vector<1x128xf32>
    %51 = vector.shape_cast %48 : vector<1x128xf32> to vector<1x1x128xf32>
    tpu.vector_store %arg3[%c2_18, %c0_19, %c0_20], %51 {strides = array<i32>} : memref<3x1x128xf32, #tpu.memory_space<vmem>>, vector<1x1x128xf32>,
    return
  }
  func.func @transform_0(%arg0: i32, %arg1: memref<7xf32, #tpu.memory_space<smem>>) -> (i32, i32, i32) {
    %c0_i32 = arith.constant 0 : i32
    %c0_i32_0 = arith.constant 0 : i32
    %c0_i32_1 = arith.constant 0 : i32
    return %c0_i32, %arg0, %c0_i32_0 : i32, i32, i32
  }
  func.func @transform_1(%arg0: i32, %arg1: memref<7xf32, #tpu.memory_space<smem>>) -> (i32, i32, i32) {
    %c0_i32 = arith.constant 0 : i32
    %c0_i32_0 = arith.constant 0 : i32
    %c0_i32_1 = arith.constant 0 : i32
    return %c0_i32, %arg0, %c0_i32_0 : i32, i32, i32
  }
}

</mosaic_0001>

<bundles_post_ra>
// kernel: network_forward.1
= control target key start
LH: loop header
LB: loop body
LE: loop exit
PB: predicated region body
PF: predicated region fallthrough
CT: control target
= control target key end

     0   :  { %s142_s0 = inlined_call_operand.vmem [shape: f32[7], index: 0, kind: input, shape index: {}]   ;;  %s143_s1 = inlined_call_operand.vmem [shape: f32[4,1,128], index: 1, kind: input, shape index: {}]   ;;  %s144_s2 = inlined_call_operand.vmem [shape: f32[3,1,128], index: 2, kind: output, shape index: {}]  }
   0x1   :  { %s7_s11 = sshll.u32 %s142_s0, 4  ;;  %s8_s11 = int_to_ptr.vmem [resolvable:$true] %s7_s11 }
   0x2   :  { %s88_s12 = scalar_lea.vmem %s8_s11, 16  ;;  %p93_p1 = scmp.lt.s32.totalorder %s8_s11, %s8_s11 }
   0x3   :  { %p89_p0 = scmp.ne.s32.totalorder %s8_s11, %s88_s12  ;;  %p94_p2 = scmp.lt.s32.totalorder %s88_s12, %s88_s12 }
   0x5   :  { %p95_p3 = por %p94_p2, %p93_p1 }
   0x7   :  { %p96_p4 = pnand %p95_p3, %p89_p0 }
   0x9   :  { %99 = shalt.err (!%p96_p4)  }
   0xa   :  { %s102_s13 = smov [#allocation3]  }
   0xb   :  { %10 = dma.vmem_to_smem %s8_s11, 16, %s102_s13, [#allocation2] }
   0xc   :  { %100 = dma.done.wait [#allocation2], 16 }
   0xd   :  { %101 = vsyncadd [#allocation2], 4294967280 }
   0xe   :  { %12 = sfence }
   0xf   :  { %s16_s14 = sld [smem:[#allocation3]]  ;;  %v15_v0 = vld [vmem:[%s143_s1] sm:$0x1]  ;;  %v68_v1 = vld [vmem:[%s143_s1 + $0x1] sm:$0x1] }
  0x10   :  { %s69_s15 = sld [smem:[#allocation3 + $0x1]]  ;;  %v70_v3 = vld [vmem:[%s143_s1 + $0x2] sm:$0x1]  ;;  %v72_v6 = vld [vmem:[%s143_s1 + $0x3] sm:$0x1] }
  0x11   :  { %s71_s16 = sld [smem:[#allocation3 + $0x2]] }
  0x12   :  { %s73_s17 = sld [smem:[#allocation3 + $0x3]] }
  0x13   :  { %s74_s21 = sld [smem:[#allocation3 + $0x4]] }
  0x14   :  { %s75_s24 = sld [smem:[#allocation3 + $0x5]] }
  0x15   :  { %v17_v2 = vstv %s16_s14  ;;  %s76_s27 = sld [smem:[#allocation3 + $0x6]] }
  0x16   :  { %v18_v4 = vmul.f32 %v17_v2, %v15_v0  ;;  %v22_v5 = vstv %s69_s15 }
  0x17   :  { %v23_v7 = vmul.f32 %v68_v1, %v22_v5  ;;  %v28_v8 = vstv %s71_s16 }
  0x18   :  { %v29_v9 = vmul.f32 %v70_v3, %v28_v8  ;;  %v34_v10 = vstv %s73_s17 }
  0x19   :  { %v24_v11 = vadd.f32 %v23_v7, %v18_v4  ;;  %v35_v12 = vmul.f32 %v72_v6, %v34_v10  ;;  %v39_v15 = vstv %s74_s21 }
  0x1a   :  { %v44_v16 = vstv %s75_s24 }
  0x1b   :  { %v30_v13 = vadd.f32 %v29_v9, %v24_v11  ;;  %v49_v17 = vstv %s76_s27 }
  0x1d   :  { %v36_v14 = vadd.f32 %v35_v12, %v30_v13 }
  0x1f   :  { %v37_v18 = vmax.f32 %v36_v14, 0.0 }
  0x21   :  { %v40_v19 = vmul.f32 %v39_v15, %v37_v18  ;;  %v45_v20 = vmul.f32 %v44_v16, %v37_v18  ;;  %v50_v21 = vmul.f32 %v49_v17, %v37_v18 }
  0x23   :  { %v41_v22 = vmul.f32 1.442695, %v40_v19  ;;  %v46_v23 = vmul.f32 1.442695, %v45_v20  ;;  %v51_v24 = vmul.f32 1.442695, %v50_v21 }
  0x25   :  { %80 = vpow2.f32 %v41_v22 }
  0x26   :  { %82 = vpow2.f32 %v46_v23 }
  0x27   :  { %84 = vpow2.f32 %v51_v24 }
  0x32   :  { %v81_v25 = vpop.eup %80 }
  0x33   :  { %v83_v26 = vpop.eup %82 }
  0x34   :  { %v85_v27 = vpop.eup %84  ;;  %v53_v28 = vadd.f32 %v83_v26, %v81_v25 }
  0x36   :  { %v54_v29 = vadd.f32 %v85_v27, %v53_v28 }
  0x38   :  { %86 = vrcp.f32 %v54_v29 }
  0x45   :  { %v87_v30 = vpop.eup %86 }
  0x46   :  { %v56_v31 = vmul.f32 %v87_v30, %v81_v25  ;;  %v58_v32 = vmul.f32 %v87_v30, %v83_v26  ;;  %v61_v33 = vmul.f32 %v87_v30, %v85_v27 }
  0x48   :  { %57 = vst [vmem:[%s144_s2] sm:$0x1] %v56_v31  ;;  %77 = vst [vmem:[%s144_s2 + $0x1] sm:$0x1] %v58_v32 }
  0x49   :  { %78 = vst [vmem:[%s144_s2 + $0x2] sm:$0x1] %v61_v33 }

</bundles_post_ra>
